<compile_context>
chip_gen: v5e
topology: v5e:2x2
jax: 0.10.0
libtpu: 0.0.40
codegen_flags: <defaults>
</compile_context>

<pallas_src>
import functools

import jax
import jax.numpy as jnp
from jax import lax
from jax.experimental import pallas as pl
from jax.experimental.pallas import tpu as pltpu

H1_PAD = 64            # 60 -> 64  (sublane-friendly; zero rows are inert through ReLU)
H2_PAD = 32            # 25 -> 32
LANE = 128
MIN_SPLIT_TM = 256     # don't shrink tiles below this just to manufacture 2 grid steps
X_BLOCK_BYTES = 4 * 1024 * 1024   # ~4 MiB f32 x tile: measured sweeps hit ~85% of HBM roofline


def _round_up(n, m):
    return ((n + m - 1) // m) * m


def _choose_tm(B, D):
    """Batch-tile rows.

    Big enough to amortize the ~0.35 us per-grid-step overhead (~4 MiB of x per
    block), small enough that 2 x-buffers + resident weights stay well under the
    32 MiB scoped-VMEM default (and v7x's 64 MiB physical), and split so the grid
    has >= 2 steps when the batch allows (keeps both v7x TensorCores busy).
    """
    d_lanes = _round_up(max(D, 1), LANE)                 # VMEM lane footprint of one x row
    tm_cap = max(512, (X_BLOCK_BYTES // (d_lanes * 4)) // LANE * LANE)
    b_up = _round_up(B, LANE)
    if b_up > tm_cap:
        return tm_cap                                    # grid >= 2 automatically
    if b_up >= 2 * MIN_SPLIT_TM:
        return _round_up(b_up // 2, LANE)                # two roughly equal tiles
    return b_up                                          # single tile covers the batch


def _epilogue_dtype():
    """bf16 bias+ReLU epilogue on chips with a bf16 VPU (v6e/v7x); f32 elsewhere."""
    try:
        kind = jax.devices()[0].device_kind.lower()
    except Exception:
        return jnp.float32
    return jnp.bfloat16 if ("v6" in kind or "v7" in kind) else jnp.float32


def _mlp_kernel(x_ref, w1_ref, b1_ref, w2_ref, b2_ref, w3_ref, b3_ref, o_ref, *,
                act_dtype):
    # x_ref : (TM, D)   f32   batch tile (rows on sublanes, features on lanes)
    # w1_ref: (H1, D)   bf16  PyTorch-layout (out, in), zero-padded 60 -> 64
    # b1_ref: (H1, 1)   f32
    # w2_ref: (H2, H1)  bf16  zero-padded (25, 60) -> (32, 64)
    # b2_ref: (H2, 1)   f32
    # w3_ref: (1, H2)   bf16  final-layer weights as a lane-dense row
    # b3_ref: (1, 1)    f32
    # o_ref : (1, TM)   f32   lane-dense output row
    # In-kernel cast: free VPU work, avoids a separate HBM read+write cast pass.
    x = x_ref[...].astype(jnp.bfloat16)

    # Layer 1: contract (H1, D) with (TM, D) over D -> (H1, TM); bf16 MXU, f32 accumulate.
    h1 = lax.dot_general(
        w1_ref[...], x,
        dimension_numbers=(((1,), (1,)), ((), ())),
        preferred_element_type=jnp.float32)
    h1 = jnp.maximum(h1.astype(act_dtype) + b1_ref[...].astype(act_dtype), 0)
    h1 = h1.astype(jnp.bfloat16)

    # Layer 2: (H2, H1) @ (H1, TM) -> (H2, TM); bf16 MXU, f32 accumulate.
    h2 = jnp.dot(w2_ref[...], h1, preferred_element_type=jnp.float32)
    h2 = jnp.maximum(h2.astype(act_dtype) + b2_ref[...].astype(act_dtype), 0)
    h2 = h2.astype(jnp.bfloat16)

    # Layer 3 on the otherwise-idle MXU: (1, H2) @ (H2, TM) -> (1, TM), then bias.
    out = jnp.dot(w3_ref[...], h2, preferred_element_type=jnp.float32)
    o_ref[...] = (out + b3_ref[...]).astype(o_ref.dtype)


@jax.jit
def fully_connected_forward(x, params):
    """Fused forward pass. x: (B, D) float array. Returns (B, 1) float32 logits."""
    w1, b1, w2, b2, w3, b3 = params
    B, D = x.shape
    H1, H2 = w1.shape[0], w2.shape[0]

    TM = _choose_tm(B, D)
    grid = (pl.cdiv(B, TM),)        # ragged batch -> partial tail block, no jnp.pad pass
    kernel = functools.partial(_mlp_kernel, act_dtype=_epilogue_dtype())

    out = pl.pallas_call(
        kernel,
        out_shape=jax.ShapeDtypeStruct((1, B), jnp.float32),
        grid=grid,
        in_specs=[
            pl.BlockSpec((TM, D), lambda i: (i, 0)),     # x: streamed, double-buffered
            pl.BlockSpec((H1, D), lambda i: (0, 0)),     # weights: DMA'd once, VMEM-resident
            pl.BlockSpec((H1, 1), lambda i: (0, 0)),
            pl.BlockSpec((H2, H1), lambda i: (0, 0)),
            pl.BlockSpec((H2, 1), lambda i: (0, 0)),
            pl.BlockSpec((1, H2), lambda i: (0, 0)),
            pl.BlockSpec((1, 1), lambda i: (0, 0)),
        ],
        out_specs=pl.BlockSpec((1, TM), lambda i: (0, i)),   # lane-dense output slab
        compiler_params=pltpu.CompilerParams(
            dimension_semantics=("parallel",),               # shard batch tiles across TCs
            vmem_limit_bytes=32 * 1024 * 1024,               # tiles sized to ~12 MiB max
        ),
    )(x, w1, b1, w2, b2, w3, b3)

    return out[0, :].reshape(B, 1)


def init_raw_params(key, dim_in):
    """PyTorch-layout params (weight (out,in), bias (out,)), nn.Linear default init."""
    shapes = [(60, dim_in), (25, 60), (1, 25)]
    params = []
    for out_f, in_f in shapes:
        key, kw, kb = jax.random.split(key, 3)
        bound = 1.0 / float(in_f) ** 0.5
        w = jax.random.uniform(kw, (out_f, in_f), jnp.float32, -bound, bound)
        b = jax.random.uniform(kb, (out_f,), jnp.float32, -bound, bound)
        params.extend([w, b])
    return params


def prepare_kernel_params(raw):
    """Pad hidden dims (60->64, 25->32), cast matmul weights to bf16, reshape biases."""
    w1, b1, w2, b2, w3, b3 = raw
    D = w1.shape[1]
    w1p = jnp.zeros((H1_PAD, D), jnp.float32).at[:60, :].set(w1).astype(jnp.bfloat16)
    b1p = jnp.zeros((H1_PAD, 1), jnp.float32).at[:60, 0].set(b1)
    w2p = jnp.zeros((H2_PAD, H1_PAD), jnp.float32).at[:25, :60].set(w2).astype(jnp.bfloat16)
    b2p = jnp.zeros((H2_PAD, 1), jnp.float32).at[:25, 0].set(b2)
    w3p = jnp.zeros((1, H2_PAD), jnp.float32).at[0, :25].set(w3[0]).astype(jnp.bfloat16)
    b3p = b3.reshape(1, 1).astype(jnp.float32)
    return [w1p, b1p, w2p, b2p, w3p, b3p]


def fully_connected_apply(batch, params):
    """Mirrors FullyConnected.forward: batch['data'] -> dict(logits=...)."""
    return dict(logits=fully_connected_forward(batch["data"], params))


def reference_forward(x, raw):
    w1, b1, w2, b2, w3, b3 = raw
    h = jnp.maximum(x @ w1.T + b1, 0.0)
    h = jnp.maximum(h @ w2.T + b2, 0.0)
    return h @ w3.T + b3


if __name__ == "__main__":
    key = jax.random.PRNGKey(0)
    k_params, k_small, k_big, k_rag = jax.random.split(key, 4)

    D = 32
    raw = init_raw_params(k_params, D)
    params = prepare_kernel_params(raw)

    # Small case: single (partial) tile, B=8.
    x_small = jax.random.normal(k_small, (8, D), jnp.float32)
    got = jax.block_until_ready(fully_connected_apply({"data": x_small}, params)["logits"])
    ref = reference_forward(x_small, raw)
    assert got.shape == (8, 1)
    assert jnp.allclose(got, ref, atol=3e-2, rtol=3e-2), float(jnp.max(jnp.abs(got - ref)))

    # Multi-tile case: 2 grid steps with a partial tail block (640 rows, TM=384).
    x_big = jax.random.normal(k_big, (640, D), jnp.float32)
    got_b = jax.block_until_ready(fully_connected_apply({"data": x_big}, params)["logits"])
    ref_b = reference_forward(x_big, raw)
    assert got_b.shape == (640, 1)
    assert jnp.allclose(got_b, ref_b, atol=3e-2, rtol=3e-2), float(jnp.max(jnp.abs(got_b - ref_b)))

    # Ragged case: B not a multiple of 128 (exercises masked tail store, no padding pass).
    x_rag = jax.random.normal(k_rag, (300, D), jnp.float32)
    got_r = jax.block_until_ready(fully_connected_apply({"data": x_rag}, params)["logits"])
    ref_r = reference_forward(x_rag, raw)
    assert got_r.shape == (300, 1)
    assert jnp.allclose(got_r, ref_r, atol=3e-2, rtol=3e-2), float(jnp.max(jnp.abs(got_r - ref_r)))

    print("KERNEL_OK")
</pallas_src>

<mosaic_0001>
module attributes {stable_mosaic.version = 11 : i64} {
  func.func @_mlp_kernel(%arg0: i32, %arg1: memref<128x32xf32, #tpu.memory_space<vmem>>, %arg2: memref<64x32xbf16, #tpu.memory_space<vmem>>, %arg3: memref<64x1xf32, #tpu.memory_space<vmem>>, %arg4: memref<32x64xbf16, #tpu.memory_space<vmem>>, %arg5: memref<32x1xf32, #tpu.memory_space<vmem>>, %arg6: memref<1x32xbf16, #tpu.memory_space<vmem>>, %arg7: memref<1x1xf32, #tpu.memory_space<vmem>>, %arg8: memref<1x128xf32, #tpu.memory_space<vmem>>) attributes {dimension_semantics = [#tpu.dimension_semantics<parallel>], iteration_bounds = array<i64: 1>, scalar_prefetch = 0 : i64, scratch_operands = 0 : i64, tpu.core_type = #tpu.core_type<tc>, window_params = [{transform_indices = @transform_0, window_bounds = array<i64: 128, 32>}, {pipeline_mode = #tpu.pipeline_mode<synchronous>, transform_indices = @transform_1, window_bounds = array<i64: 64, 32>}, {pipeline_mode = #tpu.pipeline_mode<synchronous>, transform_indices = @transform_2, window_bounds = array<i64: 64, 1>}, {pipeline_mode = #tpu.pipeline_mode<synchronous>, transform_indices = @transform_3, window_bounds = array<i64: 32, 64>}, {pipeline_mode = #tpu.pipeline_mode<synchronous>, transform_indices = @transform_4, window_bounds = array<i64: 32, 1>}, {pipeline_mode = #tpu.pipeline_mode<synchronous>, transform_indices = @transform_5, window_bounds = array<i64: 1, 32>}, {pipeline_mode = #tpu.pipeline_mode<synchronous>, transform_indices = @transform_6, window_bounds = array<i64: 1, 1>}, {transform_indices = @transform_7, window_bounds = array<i64: 1, 128>}]} {
    %c0 = arith.constant 0 : index
    %c0_0 = arith.constant 0 : index
    %0 = vector.load %arg1[%c0, %c0_0] : memref<128x32xf32, #tpu.memory_space<vmem>>, vector<128x32xf32>
    %1 = arith.truncf %0 : vector<128x32xf32> to vector<128x32xbf16>
    %c0_1 = arith.constant 0 : index
    %c0_2 = arith.constant 0 : index
    %2 = vector.load %arg2[%c0_1, %c0_2] : memref<64x32xbf16, #tpu.memory_space<vmem>>, vector<64x32xbf16>
    %cst = arith.constant dense<0.000000e+00> : vector<64x128xf32>
    %3 = tpu.matmul %2, %1, %cst {dimension_numbers = #tpu.dot_dimension_numbers<[1], [1], [0], [0], [0, 0, 1, 0], [], []>} : vector<64x32xbf16>, vector<128x32xbf16>, vector<64x128xf32> -> vector<64x128xf32>
    %c0_3 = arith.constant 0 : index
    %c0_4 = arith.constant 0 : index
    %4 = vector.load %arg3[%c0_3, %c0_4] : memref<64x1xf32, #tpu.memory_space<vmem>>, vector<64x1xf32>
    %5 = vector.broadcast %4 : vector<64x1xf32> to vector<64x128xf32>
    %6 = arith.addf %3, %5 : vector<64x128xf32>
    %cst_5 = arith.constant 0.000000e+00 : f32
    %7 = vector.broadcast %cst_5 : f32 to vector<64x128xf32>
    %8 = arith.maximumf %6, %7 : vector<64x128xf32>
    %9 = arith.truncf %8 : vector<64x128xf32> to vector<64x128xbf16>
    %c0_6 = arith.constant 0 : index
    %c0_7 = arith.constant 0 : index
    %10 = vector.load %arg4[%c0_6, %c0_7] : memref<32x64xbf16, #tpu.memory_space<vmem>>, vector<32x64xbf16>
    %cst_8 = arith.constant dense<0.000000e+00> : vector<32x128xf32>
    %11 = tpu.matmul %10, %9, %cst_8 {dimension_numbers = #tpu.dot_dimension_numbers<[1], [0], [0], [1], [0, 0, 1, 1], [], []>} : vector<32x64xbf16>, vector<64x128xbf16>, vector<32x128xf32> -> vector<32x128xf32>
    %c0_9 = arith.constant 0 : index
    %c0_10 = arith.constant 0 : index
    %12 = vector.load %arg5[%c0_9, %c0_10] : memref<32x1xf32, #tpu.memory_space<vmem>>, vector<32x1xf32>
    %13 = vector.broadcast %12 : vector<32x1xf32> to vector<32x128xf32>
    %14 = arith.addf %11, %13 : vector<32x128xf32>
    %cst_11 = arith.constant 0.000000e+00 : f32
    %15 = vector.broadcast %cst_11 : f32 to vector<32x128xf32>
    %16 = arith.maximumf %14, %15 : vector<32x128xf32>
    %17 = arith.truncf %16 : vector<32x128xf32> to vector<32x128xbf16>
    %c0_12 = arith.constant 0 : index
    %c0_13 = arith.constant 0 : index
    %18 = vector.load %arg6[%c0_12, %c0_13] : memref<1x32xbf16, #tpu.memory_space<vmem>>, vector<1x32xbf16>
    %cst_14 = arith.constant dense<0.000000e+00> : vector<1x128xf32>
    %19 = tpu.matmul %18, %17, %cst_14 {dimension_numbers = #tpu.dot_dimension_numbers<[1], [0], [0], [1], [0, 0, 1, 1], [], []>} : vector<1x32xbf16>, vector<32x128xbf16>, vector<1x128xf32> -> vector<1x128xf32>
    %c0_15 = arith.constant 0 : index
    %c0_16 = arith.constant 0 : index
    %20 = vector.load %arg7[%c0_15, %c0_16] : memref<1x1xf32, #tpu.memory_space<vmem>>, vector<1x1xf32>
    %21 = vector.broadcast %20 : vector<1x1xf32> to vector<1x128xf32>
    %22 = arith.addf %19, %21 : vector<1x128xf32>
    %c0_17 = arith.constant 0 : index
    %c0_18 = arith.constant 0 : index
    %23 = vector.load %arg8[%c0_17, %c0_18] : memref<1x128xf32, #tpu.memory_space<vmem>>, vector<1x128xf32>
    tpu.vector_store %arg8[%c0_17, %c0_18], %22 {strides = array<i32>} : memref<1x128xf32, #tpu.memory_space<vmem>>, vector<1x128xf32>,
    return
  }
  func.func @transform_0(%arg0: i32) -> (i32, i32) {
    %c0_i32 = arith.constant 0 : i32
    %c0_i32_0 = arith.constant 0 : i32
    return %arg0, %c0_i32 : i32, i32
  }
  func.func @transform_1(%arg0: i32) -> (i32, i32) {
    %c0_i32 = arith.constant 0 : i32
    %c0_i32_0 = arith.constant 0 : i32
    %c0_i32_1 = arith.constant 0 : i32
    return %c0_i32, %c0_i32_0 : i32, i32
  }
  func.func @transform_2(%arg0: i32) -> (i32, i32) {
    %c0_i32 = arith.constant 0 : i32
    %c0_i32_0 = arith.constant 0 : i32
    %c0_i32_1 = arith.constant 0 : i32
    return %c0_i32, %c0_i32_0 : i32, i32
  }
  func.func @transform_3(%arg0: i32) -> (i32, i32) {
    %c0_i32 = arith.constant 0 : i32
    %c0_i32_0 = arith.constant 0 : i32
    %c0_i32_1 = arith.constant 0 : i32
    return %c0_i32, %c0_i32_0 : i32, i32
  }
  func.func @transform_4(%arg0: i32) -> (i32, i32) {
    %c0_i32 = arith.constant 0 : i32
    %c0_i32_0 = arith.constant 0 : i32
    %c0_i32_1 = arith.constant 0 : i32
    return %c0_i32, %c0_i32_0 : i32, i32
  }
  func.func @transform_5(%arg0: i32) -> (i32, i32) {
    %c0_i32 = arith.constant 0 : i32
    %c0_i32_0 = arith.constant 0 : i32
    %c0_i32_1 = arith.constant 0 : i32
    return %c0_i32, %c0_i32_0 : i32, i32
  }
  func.func @transform_6(%arg0: i32) -> (i32, i32) {
    %c0_i32 = arith.constant 0 : i32
    %c0_i32_0 = arith.constant 0 : i32
    %c0_i32_1 = arith.constant 0 : i32
    return %c0_i32, %c0_i32_0 : i32, i32
  }
  func.func @transform_7(%arg0: i32) -> (i32, i32) {
    %c0_i32 = arith.constant 0 : i32
    %c0_i32_0 = arith.constant 0 : i32
    return %c0_i32, %arg0 : i32, i32
  }
}

</mosaic_0001>

<bundles_post_ra>
// kernel: fully_connected_forward.1
= control target key start
LH: loop header
LB: loop body
LE: loop exit
PB: predicated region body
PF: predicated region fallthrough
CT: control target
= control target key end

     0   :  { %s561_s0 = inlined_call_operand.vmem [shape: f32[8,32], index: 0, kind: input, shape index: {}]   ;;  %s562_s1 = inlined_call_operand.vmem [shape: bf16[64,32], index: 1, kind: input, shape index: {}]   ;;  %s563_s2 = inlined_call_operand.vmem [shape: f32[64,1], index: 2, kind: input, shape index: {}]   ;;  %s564_s3 = inlined_call_operand.vmem [shape: bf16[32,64], index: 3, kind: input, shape index: {}]   ;;  %s565_s4 = inlined_call_operand.vmem [shape: f32[32,1], index: 4, kind: input, shape index: {}]   ;;  %s566_s5 = inlined_call_operand.vmem [shape: bf16[1,32], index: 5, kind: input, shape index: {}]   ;;  %s567_s6 = inlined_call_operand.<no memory space> [shape: f32[1,1], index: 6, kind: input, shape index: {}]   ;;  %s568_s7 = inlined_call_operand.hbm [shape: f32[1,8], index: 7, kind: output, shape index: {}]  }
   0x1   :  { %v12_v0 = vstv %s567_s6 }
   0x2   :  { %13 = vst [vmem:[#allocation2] sm:$0x1] %v12_v0 }
   0x3   :  { %v44_v1 = vld [vmem:[%s561_s0 + $0x70] sm:$0xff]  ;;  %v45_v2 = vld [vmem:[%s561_s0 + $0x78] sm:$0xff]  ;;  %vm130_vm0 = vcmask 261120   ;;  %v42_v4 = vld [vmem:[%s561_s0 + $0x60] sm:$0xff] }
   0x4   :  { %v53_v3 = vpack.c.bf16 %v45_v2, %v44_v1  ;;  %v43_v5 = vld [vmem:[%s561_s0 + $0x68] sm:$0xff] }
   0x6   :  { %v165_v6 = vsel %vm130_vm0, %v53_v3, 0 }
   0x7   :  { %14 = vsyncpa [#allocation4], 0  ;;  %356 = vmatpush.bf16.xpose.msra.mxu3 %v165_v6  ;;  %167 = vmatpush.bf16.xpose.msra.mxu0 %v165_v6  ;;  %v52_v7 = vpack.c.bf16 %v43_v5, %v42_v4  ;;  %v40_v9 = vld [vmem:[%s561_s0 + $0x50] sm:$0xff]  ;;  %v41_v10 = vld [vmem:[%s561_s0 + $0x58] sm:$0xff]  ;;  %v395_v24 = vmov 0   ;;  %vm246_vm1 = vcmask 523264  }
   0x8   :  { %v51_v11 = vpack.c.bf16 %v41_v10, %v40_v9  ;;  %v38_v13 = vld [vmem:[%s561_s0 + $0x40] sm:$0xff]  ;;  %v39_v14 = vld [vmem:[%s561_s0 + $0x48] sm:$0xff]  ;;  %v36_v17 = vld [vmem:[%s561_s0 + $0x30] sm:$0xff]  ;;  %366 = vset.pattern.permute.xlu0 %v395_v24  ;;  %367 = vset.pattern.permute.xlu1 %v395_v24  ;;  %s396_s18 = smov [#allocation3]   ;;  %s310_s22 = sshll.u32 %s568_s7, 4  ;;  %s311_s22 = int_to_ptr.hbm [resolvable:$true] %s310_s22 }
   0x9   :  { %v162_v8 = vsel %vm130_vm0, %v52_v7, 0  ;;  %v50_v15 = vpack.c.bf16 %v39_v14, %v38_v13  ;;  %v37_v18 = vld [vmem:[%s561_s0 + $0x38] sm:$0xff]  ;;  %v34_v21 = vld [vmem:[%s561_s0 + $0x20] sm:$0xff]  ;;  %v35_v22 = vld [vmem:[%s561_s0 + $0x28] sm:$0xff]  ;;  %368 = vset.pattern.permute.xlu2 %v395_v24  ;;  %s308_s19 = sshll.u32 %s396_s18, 4  ;;  %s309_s19 = int_to_ptr.vmem [resolvable:$true] %s308_s19 }
   0xa   :  { %v159_v12 = vsel %vm130_vm0, %v51_v11, 0  ;;  %v49_v19 = vpack.c.bf16 %v37_v18, %v36_v17  ;;  %v48_v23 = vpack.c.bf16 %v35_v22, %v34_v21  ;;  %v32_v26 = vld [vmem:[%s561_s0 + $0x10] sm:$0xff]  ;;  %v33_v27 = vld [vmem:[%s561_s0 + $0x18] sm:$0xff]  ;;  %v30_v30 = vld [vmem:[%s561_s0] sm:$0xff] }
   0xb   :  { %v156_v16 = vsel %vm130_vm0, %v50_v15, 0  ;;  %v47_v28 = vpack.c.bf16 %v33_v27, %v32_v26  ;;  %v31_v31 = vld [vmem:[%s561_s0 + $0x8] sm:$0xff]  ;;  %v68_v32 = vld [vmem:[%s563_s2 + $0x30] sm:$0xff]  ;;  %v66_v33 = vld [vmem:[%s563_s2 + $0x20] sm:$0xff] }
   0xc   :  { %v153_v20 = vsel %vm130_vm0, %v49_v19, 0  ;;  %v150_v25 = vsel %vm130_vm0, %v48_v23, 0  ;;  %v46_v34 = vpack.c.bf16 %v31_v31, %v30_v30  ;;  %102 = vperm.xlu0 %366, %v68_v32   ;;  %92 = vperm.xlu1 %367, %v66_v33   ;;  %v69_v36 = vld [vmem:[%s563_s2 + $0x38] sm:$0xff]  ;;  %v351_v37 = vld [vmem:[%s562_s1 + $0x8] sm:$0xff]  ;;  %v350_v38 = vld [vmem:[%s562_s1] sm:$0xff] }
   0xd   :  { %v147_v29 = vsel %vm130_vm0, %v47_v28, 0  ;;  %v62_v39 = vld [vmem:[%s563_s2] sm:$0xff]  ;;  %v67_v40 = vld [vmem:[%s563_s2 + $0x28] sm:$0xff]  ;;  %v64_v41 = vld [vmem:[%s563_s2 + $0x10] sm:$0xff] }
   0xe   :  { %v144_v35 = vsel %vm130_vm0, %v46_v34, 0  ;;  %82 = vperm.xlu2 %368, %v64_v41   ;;  %v63_v42 = vld [vmem:[%s563_s2 + $0x8] sm:$0xff]  ;;  %v65_v43 = vld [vmem:[%s563_s2 + $0x18] sm:$0xff]  ;;  %v352_v45 = vld [vmem:[%s562_s1 + $0x10] sm:$0xff] }
   0xf   :  { %357 = vmatpush.bf16.xpose.msra.mxu3 %v162_v8  ;;  %168 = vmatpush.bf16.xpose.msra.mxu0 %v162_v8  ;;  %v215_v44 = vld [vmem:[%s565_s4 + $0x18] sm:$0xff]  ;;  %v212_v46 = vld [vmem:[%s565_s4] sm:$0xff]  ;;  %v214_v47 = vld [vmem:[%s565_s4 + $0x10] sm:$0xff] }
  0x10   :  { %v279_v48 = vld [vmem:[#allocation2] sm:$0x1]  ;;  %v213_v49 = vld [vmem:[%s565_s4 + $0x8] sm:$0xff]  ;;  %v353_v50 = vld [vmem:[%s562_s1 + $0x18] sm:$0xff] }
  0x11   :  { %v354_v23 = vld [vmem:[%s564_s3] sm:$0xff]  ;;  %v355_v24 = vld [vmem:[%s564_s3 + $0x8] sm:$0xff] }
  0x14   :  { %107 = vperm.xlu0 %366, %v69_v36   ;;  %97 = vperm.xlu1 %367, %v67_v40  }
  0x16   :  { %87 = vperm.xlu2 %368, %v65_v43   ;;  %v278_v43 = vld [vmem:[%s566_s5] sm:$0x1] }
  0x17   :  { %358 = vmatpush.bf16.xpose.msra.mxu3 %v159_v12  ;;  %169 = vmatpush.bf16.xpose.msra.mxu0 %v159_v12 }
  0x1c   :  { %72 = vperm.xlu0 %366, %v62_v39   ;;  %77 = vperm.xlu1 %367, %v63_v42  }
  0x1e   :  { %228 = vperm.xlu2 %368, %v214_v47  }
  0x1f   :  { %359 = vmatpush.bf16.xpose.msra.mxu3 %v156_v16  ;;  %170 = vmatpush.bf16.xpose.msra.mxu0 %v156_v16 }
  0x24   :  { %233 = vperm.xlu0 %366, %v215_v44   ;;  %218 = vperm.xlu1 %367, %v212_v46  }
  0x26   :  { %223 = vperm.xlu2 %368, %v213_v49  }
  0x27   :  { %360 = vmatpush.bf16.xpose.msra.mxu3 %v153_v20  ;;  %171 = vmatpush.bf16.xpose.msra.mxu0 %v153_v20 }
  0x2c   :  { %282 = vperm.xlu0 %366, %v279_v48  }
  0x2f   :  { %361 = vmatpush.bf16.xpose.msra.mxu3 %v150_v25  ;;  %172 = vmatpush.bf16.xpose.msra.mxu0 %v150_v25 }
  0x37   :  { %362 = vmatpush.bf16.xpose.msra.mxu3 %v147_v29  ;;  %173 = vmatpush.bf16.xpose.msra.mxu0 %v147_v29 }
  0x3f   :  { %363 = vmatpush.bf16.xpose.msra.mxu3 %v144_v35  ;;  %174 = vmatpush.bf16.xpose.msra.mxu0 %v144_v35 }
  0x46   :  { %336 = vmatmul.msk.bf16.vlgmr.msra.gmra.mxu3 %vm130_vm0, %v351_v37  ;;  %335 = vmatmul.msk.bf16.vlgmr.msra.gmra.mxu0 %vm130_vm0, %v350_v38 }
  0x56   :  { %337 = vmatmul.msk.bf16.gmra.mxu3 %vm130_vm0, %v352_v45 }
  0x66   :  { %338 = vmatmul.msk.bf16.gmra.mxu3 %vm130_vm0, %v353_v50 }
  0x68   :  { %v83_v57 = vpop.permute.xlu2 %82 }
  0x70   :  { %v88_v2 = vpop.permute.xlu2 %87 }
  0x78   :  { %v229_v27 = vpop.permute.xlu2 %228 }
  0x7e   :  { %v103_v55 = vpop.permute.xlu0 %102  ;;  %v93_v56 = vpop.permute.xlu1 %92 }
  0x80   :  { %v224_v31 = vpop.permute.xlu2 %223 }
  0x86   :  { %v108_v60 = vpop.permute.xlu0 %107  ;;  %v98_v61 = vpop.permute.xlu1 %97 }
  0x8e   :  { %v73_v12 = vpop.permute.xlu0 %72  ;;  %v78_v13 = vpop.permute.xlu1 %77 }
  0x96   :  { %v234_v29 = vpop.permute.xlu0 %233  ;;  %v219_v35 = vpop.permute.xlu1 %218 }
  0x9e   :  { %v283_v44 = vpop.permute.xlu0 %282 }
  0x9f   :  { %v285_v45 = vperm.slane %v283_v44, 0 }
  0xc3   :  { %v176_v59 = vpop.f32.mrf.mxu0 }
  0xc4   :  { %v177_v15 = vadd.f32 %v176_v59, %v73_v12 }
  0xc6   :  { %v196_v19 = vmax.f32 %v177_v15, 0.0 }
  0xc9   :  { %v181_v51 = vpop.f32.mrf.mxu3 }
  0xca   :  { %v182_v10 = vadd.f32 %v181_v51, %v83_v57 }
  0xcb   :  { %v178_v9 = vpop.f32.mrf.mxu0 }
  0xcc   :  { %v179_v16 = vadd.f32 %v178_v9, %v78_v13  ;;  %v198_v18 = vmax.f32 %v182_v10, 0.0 }
  0xce   :  { %v197_v20 = vmax.f32 %v179_v16, 0.0 }
  0xd0   :  { %v204_v22 = vpack.c.bf16 %v197_v20, %v196_v19 }
  0xd1   :  { %v183_v52 = vpop.f32.mrf.mxu3 }
  0xd2   :  { %v184_v6 = vadd.f32 %v183_v52, %v88_v2 }
  0xd4   :  { %v199_v14 = vmax.f32 %v184_v6, 0.0 }
  0xd6   :  { %v205_v21 = vpack.c.bf16 %v199_v14, %v198_v18 }
  0xd9   :  { %v186_v53 = vpop.f32.mrf.mxu3 }
  0xda   :  { %v187_v3 = vadd.f32 %v186_v53, %v93_v56 }
  0xdc   :  { %v200_v11 = vmax.f32 %v187_v3, 0.0 }
  0xe1   :  { %v188_v54 = vpop.f32.mrf.mxu3 }
  0xe2   :  { %v189_v0 = vadd.f32 %v188_v54, %v98_v61 }
  0xe4   :  { %v201_v7 = vmax.f32 %v189_v0, 0.0 }
  0xe6   :  { %v206_v17 = vpack.c.bf16 %v201_v7, %v200_v11 }
  0xe9   :  { %v191_v58 = vpop.f32.mrf.mxu3 }
  0xea   :  { %v192_v62 = vadd.f32 %v191_v58, %v103_v55 }
  0xec   :  { %v202_v4 = vmax.f32 %v192_v62, 0.0 }
  0xf1   :  { %v193_v63 = vpop.f32.mrf.mxu3 }
  0xf2   :  { %v194_v1 = vadd.f32 %v193_v63, %v108_v60 }
  0xf4   :  { %v203_v5 = vmax.f32 %v194_v1, 0.0 }
  0xf6   :  { %v207_v8 = vpack.c.bf16 %v203_v5, %v202_v4 }
  0xf8   :  { %257 = vmatpush.bf16.msra.mxu1 %v207_v8 }
  0xfc   :  { %258 = vmatpush.bf16.msra.mxu1 %v206_v17 }
 0x100   :  { %259 = vmatpush.bf16.msra.mxu1 %v205_v21 }
 0x104   :  { %260 = vmatpush.bf16.msra.mxu1 %v204_v22 }
 0x107   :  { %347 = vmatmul.msk.bf16.vlgmr.msra.gmra.mxu1 %vm246_vm1, %v354_v23 }
 0x117   :  { %348 = vmatmul.msk.bf16.gmra.mxu1 %vm246_vm1, %v355_v24 }
 0x184   :  { %v262_v25 = vpop.f32.mrf.mxu1 }
 0x185   :  { %v263_v36 = vadd.f32 %v262_v25, %v219_v35 }
 0x187   :  { %v272_v41 = vmax.f32 %v263_v36, 0.0 }
 0x18c   :  { %v264_v26 = vpop.f32.mrf.mxu1 }
 0x18d   :  { %v265_v33 = vadd.f32 %v264_v26, %v224_v31 }
 0x18f   :  { %v273_v39 = vmax.f32 %v265_v33, 0.0 }
 0x191   :  { %v276_v42 = vpack.c.bf16 %v273_v39, %v272_v41 }
 0x194   :  { %v267_v28 = vpop.f32.mrf.mxu1 }
 0x195   :  { %v268_v30 = vadd.f32 %v267_v28, %v229_v27 }
 0x197   :  { %v274_v37 = vmax.f32 %v268_v30, 0.0 }
 0x19c   :  { %v269_v32 = vpop.f32.mrf.mxu1 }
 0x19d   :  { %v270_v34 = vadd.f32 %v269_v32, %v234_v29 }
 0x19f   :  { %v275_v38 = vmax.f32 %v270_v34, 0.0 }
 0x1a1   :  { %v277_v40 = vpack.c.bf16 %v275_v38, %v274_v37 }
 0x1a3   :  { %295 = vmatpush.bf16.msra.mxu2 %v277_v40 }
 0x1a7   :  { %296 = vmatpush.bf16.msra.mxu2 %v276_v42 }
 0x1aa   :  { %349 = vmatmul.msk.bf16.vlgmr.msra.gmra.mxu2 %vm130_vm0, %v278_v43 }
 0x22d   :  { %v298_v46 = vpop.f32.mrf.mxu2 }
 0x22e   :  { %v299_v47 = vadd.f32 %v298_v46, %v285_v45 }
 0x230   :  { %302 = vst [vmem:[#allocation3] sm:$0x1] %v299_v47 }
 0x231   :  { %313 = dma.vmem_to_hbm [thread:$0]  %s309_s19, 16, %s311_s22, [#allocation4]  }
 0x235   :  { %v300_v48 = vpop.f32.mrf.mxu2 }
 0x236   :  { %393 = dma.done.wait [#allocation4], 16  }
 0x237   :  { %394 = vsyncadd [#allocation4], 4294967280 }
 0x238   :  { %318 = vsyncpa [#allocation4], 1 }

</bundles_post_ra>
